<compile_context>
chip_gen: v5e
topology: v5e:2x2
jax: 0.10.0
libtpu: 0.0.40
codegen_flags: <defaults>
</compile_context>

<pallas_src>
import functools

import jax
import jax.numpy as jnp
from jax import lax
from jax.experimental import pallas as pl
from jax.experimental.pallas import tpu as pltpu

_BIG = 1e30  # sentinel squared distance for padded rows / cols


def _round_up(x, m):
    return ((x + m - 1) // m) * m


def _chamfer_kernel(a_ref, b_ref, out_ref, dba_ref, dab_ref, part_ref,
                    *, n, m, tn, tm, n_i, n_j):
    i = pl.program_id(0)  # a-tile index (outer)
    j = pl.program_id(1)  # b-tile index (inner, streamed)

    # ---- one-time init of the d_ba partial-sum accumulator -----------------
    @pl.when((i == 0) & (j == 0))
    def _():
        part_ref[...] = jnp.zeros_like(part_ref)

    a = a_ref[...].astype(jnp.float32)            # (tn, D)
    b = b_ref[...].astype(jnp.float32)            # (tm, D)
    d = a.shape[1]

    # squared norms; ||b||^2 computed lane-major via ones-matmul (no transpose)
    a2 = jnp.sum(a * a, axis=1, keepdims=True)    # (tn, 1)
    ones_row = jnp.ones((1, d), jnp.float32)
    b2_row = lax.dot_general(
        ones_row, b * b,
        dimension_numbers=(((1,), (1,)), ((), ())),
        preferred_element_type=jnp.float32)       # (1, tm)

    # -2 a.b^T on the MXU
    ab = lax.dot_general(
        a, b,
        dimension_numbers=(((1,), (1,)), ((), ())),
        preferred_element_type=jnp.float32)       # (tn, tm)

    sq = a2 + b2_row - 2.0 * ab                   # squared distances (tn, tm)

    # mask padded rows / cols so they never win a min
    row_ids = i * tn + lax.broadcasted_iota(jnp.int32, (tn, tm), 0)
    col_ids = j * tm + lax.broadcasted_iota(jnp.int32, (tn, tm), 1)
    sq = jnp.where((row_ids < n) & (col_ids < m), sq, _BIG)

    row_min = jnp.min(sq, axis=1, keepdims=True)  # (tn, 1) min over this b tile
    col_min = jnp.min(sq, axis=0, keepdims=True)  # (1, tm) min over this a tile

    # ---- running min over j for the current a tile (d_ba, squared) ---------
    @pl.when(j == 0)
    def _():
        dba_ref[...] = row_min

    @pl.when(j > 0)
    def _():
        dba_ref[...] = jnp.minimum(dba_ref[...], row_min)

    # ---- running min over i for this b tile (d_ab, squared) ----------------
    @pl.when(i == 0)
    def _():
        dab_ref[pl.ds(j, 1), :] = col_min

    @pl.when(i > 0)
    def _():
        dab_ref[pl.ds(j, 1), :] = jnp.minimum(dab_ref[pl.ds(j, 1), :], col_min)

    # ---- finalize d_ba for this a tile once its b-stream is done -----------
    @pl.when(j == n_j - 1)
    def _():
        rows = i * tn + lax.broadcasted_iota(jnp.int32, (tn, 1), 0)
        d_ba = jnp.sqrt(jnp.maximum(dba_ref[...], 0.0))   # sqrt on (tn,) only
        part_ref[...] = part_ref[...] + jnp.where(rows < n, d_ba, 0.0)

    # ---- finalize everything on the last grid step --------------------------
    @pl.when((i == n_i - 1) & (j == n_j - 1))
    def _():
        cols = (lax.broadcasted_iota(jnp.int32, (n_j, tm), 0) * tm
                + lax.broadcasted_iota(jnp.int32, (n_j, tm), 1))
        d_ab = jnp.sqrt(jnp.maximum(dab_ref[...], 0.0))    # sqrt on (M,) only
        s_ab = jnp.sum(jnp.where(cols < m, d_ab, 0.0))
        s_ba = jnp.sum(part_ref[...])
        out_ref[0, 0] = (s_ab + s_ba) / jnp.float32(n + m)


def chamfer_distance(a, b, *, tn=256, tm=256):
    """a: (N, D), b: (M, D) -> scalar float32 chamfer distance (as in the spec)."""
    a = a.astype(jnp.float32)
    b = b.astype(jnp.float32)
    n, d = a.shape
    m, db = b.shape
    assert d == db

    # sublane-aligned a tiles, lane-dense (128-multiple) b tiles
    tn = min(tn, _round_up(n, 8))
    tm = min(tm, _round_up(m, 128))
    n_pad = _round_up(n, tn)
    m_pad = _round_up(m, tm)
    n_i = n_pad // tn
    n_j = m_pad // tm

    a_p = jnp.pad(a, ((0, n_pad - n), (0, 0)))
    b_p = jnp.pad(b, ((0, m_pad - m), (0, 0)))

    kernel = functools.partial(
        _chamfer_kernel, n=n, m=m, tn=tn, tm=tm, n_i=n_i, n_j=n_j)

    out = pl.pallas_call(
        kernel,
        out_shape=jax.ShapeDtypeStruct((1, 1), jnp.float32),
        grid=(n_i, n_j),
        in_specs=[
            pl.BlockSpec((tn, d), lambda i, j: (i, 0)),
            pl.BlockSpec((tm, d), lambda i, j: (j, 0)),
        ],
        out_specs=pl.BlockSpec(memory_space=pltpu.MemorySpace.SMEM),
        scratch_shapes=[
            pltpu.VMEM((tn, 1), jnp.float32),    # running d_ba min (current a tile)
            pltpu.VMEM((n_j, tm), jnp.float32),  # running d_ab min (all b tiles)
            pltpu.VMEM((tn, 1), jnp.float32),    # accumulated sum of finalized d_ba
        ],
        compiler_params=pltpu.CompilerParams(
            dimension_semantics=("arbitrary", "arbitrary")),
    )(a_p, b_p)
    return out[0, 0]


def _chamfer_reference(a, b):
    # Exact elementwise reference (no matmul trick), pure JAX.
    diff = a[:, None, :] - b[None, :, :]                  # (N, M, D)
    dists = jnp.sqrt(jnp.sum(diff * diff, axis=-1))       # (N, M)
    d_ab = jnp.min(dists, axis=0)
    d_ba = jnp.min(dists, axis=1)
    return jnp.mean(jnp.concatenate([d_ab, d_ba]))


if __name__ == "__main__":
    key = jax.random.PRNGKey(0)
    ka, kb = jax.random.split(key)

    N, M, D = 64, 48, 16
    a = jax.random.normal(ka, (N, D), dtype=jnp.float32)
    b = jax.random.normal(kb, (M, D), dtype=jnp.float32)

    out = chamfer_distance(a, b)
    out = jax.block_until_ready(out)

    ref = _chamfer_reference(a, b)
    assert jnp.allclose(out, ref, rtol=1e-3, atol=1e-3), (out, ref)

    print("KERNEL_OK")
</pallas_src>

<mosaic_0001>
module attributes {stable_mosaic.version = 11 : i64} {
  func.func @_chamfer_kernel(%arg0: i32, %arg1: i32, %arg2: memref<64x16xf32, #tpu.memory_space<vmem>>, %arg3: memref<128x16xf32, #tpu.memory_space<vmem>>, %arg4: memref<1x1xf32, #tpu.memory_space<smem>>, %arg5: memref<64x1xf32, #tpu.memory_space<vmem>>, %arg6: memref<1x128xf32, #tpu.memory_space<vmem>>, %arg7: memref<64x1xf32, #tpu.memory_space<vmem>>) attributes {dimension_semantics = [#tpu.dimension_semantics<arbitrary>, #tpu.dimension_semantics<arbitrary>], iteration_bounds = array<i64: 1, 1>, scalar_prefetch = 0 : i64, scratch_operands = 3 : i64, tpu.core_type = #tpu.core_type<tc>, window_params = [{transform_indices = @transform_0, window_bounds = array<i64: 64, 16>}, {transform_indices = @transform_1, window_bounds = array<i64: 128, 16>}, {transform_indices = @transform_2, window_bounds = array<i64: 1, 1>}]} {
    %c0_i32 = arith.constant 0 : i32
    %0 = arith.cmpi eq, %arg0, %c0_i32 : i32
    %c0_i32_0 = arith.constant 0 : i32
    %1 = arith.cmpi eq, %arg1, %c0_i32_0 : i32
    %2 = arith.andi %0, %1 : i1
    %3 = arith.extui %2 : i1 to i32
    %c0_i32_1 = arith.constant 0 : i32
    %4 = arith.cmpi ne, %3, %c0_i32_1 : i32
    scf.if %4 {
      %cst_26 = arith.constant 0.000000e+00 : f32
      %59 = vector.broadcast %cst_26 : f32 to vector<64x1xf32>
      %c0_27 = arith.constant 0 : index
      %c0_28 = arith.constant 0 : index
      %60 = vector.load %arg7[%c0_27, %c0_28] : memref<64x1xf32, #tpu.memory_space<vmem>>, vector<64x1xf32>
      tpu.vector_store %arg7[%c0_27, %c0_28], %59 {strides = array<i32>} : memref<64x1xf32, #tpu.memory_space<vmem>>, vector<64x1xf32>,
    } else {
    }
    %c0 = arith.constant 0 : index
    %c0_2 = arith.constant 0 : index
    %5 = vector.load %arg2[%c0, %c0_2] : memref<64x16xf32, #tpu.memory_space<vmem>>, vector<64x16xf32>
    %c0_3 = arith.constant 0 : index
    %c0_4 = arith.constant 0 : index
    %6 = vector.load %arg3[%c0_3, %c0_4] : memref<128x16xf32, #tpu.memory_space<vmem>>, vector<128x16xf32>
    %7 = arith.mulf %5, %5 : vector<64x16xf32>
    %cst = arith.constant dense<0.000000e+00> : vector<64xf32>
    %8 = vector.multi_reduction <add>, %7, %cst [1] : vector<64x16xf32> to vector<64xf32>
    %9 = vector.shape_cast %8 : vector<64xf32> to vector<64x1xf32>
    %cst_5 = arith.constant 1.000000e+00 : f32
    %10 = vector.broadcast %cst_5 : f32 to vector<1x16xf32>
    %11 = arith.mulf %6, %6 : vector<128x16xf32>
    %cst_6 = arith.constant dense<0.000000e+00> : vector<1x128xf32>
    %12 = tpu.matmul %10, %11, %cst_6 {dimension_numbers = #tpu.dot_dimension_numbers<[1], [1], [0], [0], [0, 0, 1, 0], [], []>} : vector<1x16xf32>, vector<128x16xf32>, vector<1x128xf32> -> vector<1x128xf32>
    %cst_7 = arith.constant dense<0.000000e+00> : vector<64x128xf32>
    %13 = tpu.matmul %5, %6, %cst_7 {dimension_numbers = #tpu.dot_dimension_numbers<[1], [1], [0], [0], [0, 0, 1, 0], [], []>} : vector<64x16xf32>, vector<128x16xf32>, vector<64x128xf32> -> vector<64x128xf32>
    %14 = vector.broadcast %9 : vector<64x1xf32> to vector<64x128xf32>
    %15 = vector.broadcast %12 : vector<1x128xf32> to vector<64x128xf32>
    %16 = arith.addf %14, %15 : vector<64x128xf32>
    %cst_8 = arith.constant 2.000000e+00 : f32
    %17 = vector.broadcast %cst_8 : f32 to vector<64x128xf32>
    %18 = arith.mulf %17, %13 : vector<64x128xf32>
    %19 = arith.subf %16, %18 : vector<64x128xf32>
    %c64_i32 = arith.constant 64 : i32
    %20 = arith.muli %arg0, %c64_i32 : i32
    %21 = tpu.iota {dimensions = array<i32: 0>} : vector<64x128xi32>
    %22 = vector.broadcast %20 : i32 to vector<64x128xi32>
    %23 = arith.addi %22, %21 : vector<64x128xi32>
    %c128_i32 = arith.constant 128 : i32
    %24 = arith.muli %arg1, %c128_i32 : i32
    %25 = tpu.iota {dimensions = array<i32: 1>} : vector<64x128xi32>
    %26 = vector.broadcast %24 : i32 to vector<64x128xi32>
    %27 = arith.addi %26, %25 : vector<64x128xi32>
    %c64_i32_9 = arith.constant 64 : i32
    %28 = vector.broadcast %c64_i32_9 : i32 to vector<64x128xi32>
    %29 = arith.cmpi slt, %23, %28 : vector<64x128xi32>
    %c48_i32 = arith.constant 48 : i32
    %30 = vector.broadcast %c48_i32 : i32 to vector<64x128xi32>
    %31 = arith.cmpi slt, %27, %30 : vector<64x128xi32>
    %32 = arith.andi %29, %31 : vector<64x128xi1>
    %cst_10 = arith.constant 1.000000e+30 : f32
    %33 = vector.broadcast %cst_10 : f32 to vector<64x128xf32>
    %34 = arith.select %32, %19, %33 : vector<64x128xi1>, vector<64x128xf32>
    %cst_11 = arith.constant dense<0x7F800000> : vector<64xf32>
    %35 = vector.multi_reduction <minimumf>, %34, %cst_11 [1] : vector<64x128xf32> to vector<64xf32>
    %36 = vector.shape_cast %35 : vector<64xf32> to vector<64x1xf32>
    %cst_12 = arith.constant dense<0x7F800000> : vector<128xf32>
    %37 = vector.multi_reduction <minimumf>, %34, %cst_12 [0] : vector<64x128xf32> to vector<128xf32>
    %38 = vector.shape_cast %37 : vector<128xf32> to vector<1x128xf32>
    %c0_i32_13 = arith.constant 0 : i32
    %39 = arith.cmpi eq, %arg1, %c0_i32_13 : i32
    %40 = arith.extui %39 : i1 to i32
    %c0_i32_14 = arith.constant 0 : i32
    %41 = arith.cmpi ne, %40, %c0_i32_14 : i32
    scf.if %41 {
      %c0_26 = arith.constant 0 : index
      %c0_27 = arith.constant 0 : index
      %59 = vector.load %arg5[%c0_26, %c0_27] : memref<64x1xf32, #tpu.memory_space<vmem>>, vector<64x1xf32>
      tpu.vector_store %arg5[%c0_26, %c0_27], %36 {strides = array<i32>} : memref<64x1xf32, #tpu.memory_space<vmem>>, vector<64x1xf32>,
    } else {
    }
    %c0_i32_15 = arith.constant 0 : i32
    %42 = arith.cmpi sgt, %arg1, %c0_i32_15 : i32
    %43 = arith.extui %42 : i1 to i32
    %c0_i32_16 = arith.constant 0 : i32
    %44 = arith.cmpi ne, %43, %c0_i32_16 : i32
    scf.if %44 {
      %c0_26 = arith.constant 0 : index
      %c0_27 = arith.constant 0 : index
      %59 = vector.load %arg5[%c0_26, %c0_27] : memref<64x1xf32, #tpu.memory_space<vmem>>, vector<64x1xf32>
      %60 = arith.minimumf %59, %36 : vector<64x1xf32>
      %c0_28 = arith.constant 0 : index
      %c0_29 = arith.constant 0 : index
      %61 = vector.load %arg5[%c0_28, %c0_29] : memref<64x1xf32, #tpu.memory_space<vmem>>, vector<64x1xf32>
      tpu.vector_store %arg5[%c0_28, %c0_29], %60 {strides = array<i32>} : memref<64x1xf32, #tpu.memory_space<vmem>>, vector<64x1xf32>,
    } else {
    }
    %c0_i32_17 = arith.constant 0 : i32
    %45 = arith.cmpi eq, %arg0, %c0_i32_17 : i32
    %46 = arith.extui %45 : i1 to i32
    %c0_i32_18 = arith.constant 0 : i32
    %47 = arith.cmpi ne, %46, %c0_i32_18 : i32
    scf.if %47 {
      %59 = arith.index_cast %arg1 : i32 to index
      %c0_26 = arith.constant 0 : index
      %60 = vector.load %arg6[%59, %c0_26] : memref<1x128xf32, #tpu.memory_space<vmem>>, vector<1x128xf32>
      tpu.vector_store %arg6[%59, %c0_26], %38 {strides = array<i32>} : memref<1x128xf32, #tpu.memory_space<vmem>>, vector<1x128xf32>,
    } else {
    }
    %c0_i32_19 = arith.constant 0 : i32
    %48 = arith.cmpi sgt, %arg0, %c0_i32_19 : i32
    %49 = arith.extui %48 : i1 to i32
    %c0_i32_20 = arith.constant 0 : i32
    %50 = arith.cmpi ne, %49, %c0_i32_20 : i32
    scf.if %50 {
      %59 = arith.index_cast %arg1 : i32 to index
      %c0_26 = arith.constant 0 : index
      %60 = vector.load %arg6[%59, %c0_26] : memref<1x128xf32, #tpu.memory_space<vmem>>, vector<1x128xf32>
      %61 = arith.minimumf %60, %38 : vector<1x128xf32>
      %62 = arith.index_cast %arg1 : i32 to index
      %c0_27 = arith.constant 0 : index
      %63 = vector.load %arg6[%62, %c0_27] : memref<1x128xf32, #tpu.memory_space<vmem>>, vector<1x128xf32>
      tpu.vector_store %arg6[%62, %c0_27], %61 {strides = array<i32>} : memref<1x128xf32, #tpu.memory_space<vmem>>, vector<1x128xf32>,
    } else {
    }
    %c0_i32_21 = arith.constant 0 : i32
    %51 = arith.cmpi eq, %arg1, %c0_i32_21 : i32
    %52 = arith.extui %51 : i1 to i32
    %c0_i32_22 = arith.constant 0 : i32
    %53 = arith.cmpi ne, %52, %c0_i32_22 : i32
    scf.if %53 {
      %c64_i32_26 = arith.constant 64 : i32
      %59 = arith.muli %arg0, %c64_i32_26 : i32
      %60 = tpu.iota {dimensions = array<i32: 0>} : vector<64x1xi32>
      %61 = vector.broadcast %59 : i32 to vector<64x1xi32>
      %62 = arith.addi %61, %60 : vector<64x1xi32>
      %c0_27 = arith.constant 0 : index
      %c0_28 = arith.constant 0 : index
      %63 = vector.load %arg5[%c0_27, %c0_28] : memref<64x1xf32, #tpu.memory_space<vmem>>, vector<64x1xf32>
      %cst_29 = arith.constant 0.000000e+00 : f32
      %64 = vector.broadcast %cst_29 : f32 to vector<64x1xf32>
      %65 = arith.maximumf %63, %64 : vector<64x1xf32>
      %66 = math.sqrt %65 : vector<64x1xf32>
      %c0_30 = arith.constant 0 : index
      %c0_31 = arith.constant 0 : index
      %67 = vector.load %arg7[%c0_30, %c0_31] : memref<64x1xf32, #tpu.memory_space<vmem>>, vector<64x1xf32>
      %c64_i32_32 = arith.constant 64 : i32
      %68 = vector.broadcast %c64_i32_32 : i32 to vector<64x1xi32>
      %69 = arith.cmpi slt, %62, %68 : vector<64x1xi32>
      %cst_33 = arith.constant 0.000000e+00 : f32
      %70 = vector.broadcast %cst_33 : f32 to vector<64x1xf32>
      %71 = arith.select %69, %66, %70 : vector<64x1xi1>, vector<64x1xf32>
      %72 = arith.addf %67, %71 : vector<64x1xf32>
      %c0_34 = arith.constant 0 : index
      %c0_35 = arith.constant 0 : index
      %73 = vector.load %arg7[%c0_34, %c0_35] : memref<64x1xf32, #tpu.memory_space<vmem>>, vector<64x1xf32>
      tpu.vector_store %arg7[%c0_34, %c0_35], %72 {strides = array<i32>} : memref<64x1xf32, #tpu.memory_space<vmem>>, vector<64x1xf32>,
    } else {
    }
    %c0_i32_23 = arith.constant 0 : i32
    %54 = arith.cmpi eq, %arg0, %c0_i32_23 : i32
    %c0_i32_24 = arith.constant 0 : i32
    %55 = arith.cmpi eq, %arg1, %c0_i32_24 : i32
    %56 = arith.andi %54, %55 : i1
    %57 = arith.extui %56 : i1 to i32
    %c0_i32_25 = arith.constant 0 : i32
    %58 = arith.cmpi ne, %57, %c0_i32_25 : i32
    scf.if %58 {
      %59 = tpu.iota {dimensions = array<i32: 0>} : vector<1x128xi32>
      %c128_i32_26 = arith.constant 128 : i32
      %60 = vector.broadcast %c128_i32_26 : i32 to vector<1x128xi32>
      %61 = arith.muli %59, %60 : vector<1x128xi32>
      %62 = tpu.iota {dimensions = array<i32: 1>} : vector<1x128xi32>
      %63 = arith.addi %61, %62 : vector<1x128xi32>
      %c0_27 = arith.constant 0 : index
      %c0_28 = arith.constant 0 : index
      %64 = vector.load %arg6[%c0_27, %c0_28] : memref<1x128xf32, #tpu.memory_space<vmem>>, vector<1x128xf32>
      %cst_29 = arith.constant 0.000000e+00 : f32
      %65 = vector.broadcast %cst_29 : f32 to vector<1x128xf32>
      %66 = arith.maximumf %64, %65 : vector<1x128xf32>
      %67 = math.sqrt %66 : vector<1x128xf32>
      %c48_i32_30 = arith.constant 48 : i32
      %68 = vector.broadcast %c48_i32_30 : i32 to vector<1x128xi32>
      %69 = arith.cmpi slt, %63, %68 : vector<1x128xi32>
      %cst_31 = arith.constant 0.000000e+00 : f32
      %70 = vector.broadcast %cst_31 : f32 to vector<1x128xf32>
      %71 = arith.select %69, %67, %70 : vector<1x128xi1>, vector<1x128xf32>
      %72 = vector.shape_cast %71 : vector<1x128xf32> to vector<1x1x128xf32>
      %cst_32 = arith.constant dense<0.000000e+00> : vector<1xf32>
      %73 = vector.multi_reduction <add>, %72, %cst_32 [1, 2] : vector<1x1x128xf32> to vector<1xf32>
      %74 = vector.shape_cast %73 : vector<1xf32> to vector<1x1x1xf32>
      %75 = vector.extract %74[0, 0, 0] : f32 from vector<1x1x1xf32>
      %c0_33 = arith.constant 0 : index
      %c0_34 = arith.constant 0 : index
      %76 = vector.load %arg7[%c0_33, %c0_34] : memref<64x1xf32, #tpu.memory_space<vmem>>, vector<64x1xf32>
      %77 = vector.shape_cast %76 : vector<64x1xf32> to vector<1x64x1xf32>
      %cst_35 = arith.constant dense<0.000000e+00> : vector<1xf32>
      %78 = vector.multi_reduction <add>, %77, %cst_35 [1, 2] : vector<1x64x1xf32> to vector<1xf32>
      %79 = vector.shape_cast %78 : vector<1xf32> to vector<1x1x1xf32>
      %80 = vector.extract %79[0, 0, 0] : f32 from vector<1x1x1xf32>
      %81 = arith.addf %75, %80 : f32
      %cst_36 = arith.constant 1.120000e+02 : f32
      %82 = arith.divf %81, %cst_36 : f32
      %c0_37 = arith.constant 0 : index
      %c0_38 = arith.constant 0 : index
      %83 = memref.load %arg4[%c0_37, %c0_38] : memref<1x1xf32, #tpu.memory_space<smem>>
      memref.store %82, %arg4[%c0_37, %c0_38] : memref<1x1xf32, #tpu.memory_space<smem>>
    } else {
    }
    return
  }
  func.func @transform_0(%arg0: i32, %arg1: i32) -> (i32, i32) {
    %c0_i32 = arith.constant 0 : i32
    %c0_i32_0 = arith.constant 0 : i32
    return %arg0, %c0_i32 : i32, i32
  }
  func.func @transform_1(%arg0: i32, %arg1: i32) -> (i32, i32) {
    %c0_i32 = arith.constant 0 : i32
    %c0_i32_0 = arith.constant 0 : i32
    return %arg1, %c0_i32 : i32, i32
  }
  func.func @transform_2(%arg0: i32, %arg1: i32) -> (i32, i32) {
    %c0_i32 = arith.constant 0 : i32
    %c0_i32_0 = arith.constant 0 : i32
    %c0_i32_1 = arith.constant 0 : i32
    return %c0_i32, %c0_i32_0 : i32, i32
  }
}

</mosaic_0001>

<bundles_post_ra>
// kernel: tpu_custom_call.1
= control target key start
LH: loop header
LB: loop body
LE: loop exit
PB: predicated region body
PF: predicated region fallthrough
CT: control target
= control target key end

     0   :  { %vm59_vm0 = vcmask 130048   ;;  %s1075_s0 = inlined_call_operand.vmem [shape: f32[64,16], index: 0, kind: input, shape index: {}]   ;;  %s1076_s1 = inlined_call_operand.vmem [shape: f32[128,16], index: 1, kind: input, shape index: {}]   ;;  %s1077_s2 = inlined_call_operand.hbm [shape: f32[1,1], index: 2, kind: output, shape index: {}]  }
   0x1   :  { %v50_v0 = vld [vmem:[%s1076_s1 + $0x78] sm:$0xff]  ;;  %v49_v1 = vld [vmem:[%s1076_s1 + $0x70] sm:$0xff] }
   0x2   :  { %719 = vmatpush.xpose.msk.msra.mxu2 %vm59_vm0, %v50_v0  ;;  %720 = vmatpush.xpose.msk.msra.mxu3 %vm59_vm0, %v50_v0  ;;  %v99_v2 = vmul.f32 %v50_v0, %v50_v0  ;;  %v98_v3 = vmul.f32 %v49_v1, %v49_v1 }
   0x3   :  { %695 = vmatpush.xpose.msk.msra.mxu1 %vm59_vm0, %v50_v0 }
   0x4   :  { %678 = vmatpush.xpose.msk.msra.mxu0 %vm59_vm0, %v99_v2 }
   0x5   :  { %7 = vsyncpa [#allocation6], 0  ;;  %v48_v4 = vld [vmem:[%s1076_s1 + $0x68] sm:$0xff]  ;;  %v47_v6 = vld [vmem:[%s1076_s1 + $0x60] sm:$0xff]  ;;  %v795_v56 = vmov 1.0   ;;  %v310_v58 = vlaneseq  ;;  %vm607_vm5 = vcmask 1040384  }
   0x6   :  { %721 = vmatpush.xpose.msk.msra.mxu2 %vm59_vm0, %v49_v1  ;;  %722 = vmatpush.xpose.msk.msra.mxu3 %vm59_vm0, %v49_v1  ;;  %v97_v5 = vmul.f32 %v48_v4, %v48_v4  ;;  %v96_v7 = vmul.f32 %v47_v6, %v47_v6  ;;  %v46_v8 = vld [vmem:[%s1076_s1 + $0x58] sm:$0xff]  ;;  %v45_v10 = vld [vmem:[%s1076_s1 + $0x50] sm:$0xff]  ;;  %v44_v12 = vld [vmem:[%s1076_s1 + $0x48] sm:$0xff]  ;;  %vm18_vm6 = vcmask 7168   ;;  %s668_s3 = sshll.u32 %s1077_s2, 4  ;;  %s798_s7 = smov [#allocation5]   ;;  %s669_s3 = int_to_ptr.hbm [resolvable:$true] %s668_s3 }
   0x7   :  { %696 = vmatpush.xpose.msk.msra.mxu1 %vm59_vm0, %v49_v1  ;;  %v95_v9 = vmul.f32 %v46_v8, %v46_v8  ;;  %v94_v11 = vmul.f32 %v45_v10, %v45_v10  ;;  %v93_v13 = vmul.f32 %v44_v12, %v44_v12  ;;  %v43_v14 = vld [vmem:[%s1076_s1 + $0x40] sm:$0xff]  ;;  %v42_v16 = vld [vmem:[%s1076_s1 + $0x38] sm:$0xff]  ;;  %v41_v18 = vld [vmem:[%s1076_s1 + $0x30] sm:$0xff]  ;;  %v330_v62 = vand.u32 127, %v310_v58 }
   0x8   :  { %679 = vmatpush.xpose.msk.msra.mxu0 %vm59_vm0, %v98_v3  ;;  %v92_v15 = vmul.f32 %v43_v14, %v43_v14  ;;  %v91_v17 = vmul.f32 %v42_v16, %v42_v16  ;;  %v882_v19 = vld [vmem:[%s1075_s0] sm:$0xff]  ;;  %v90_v20 = vmul.f32 %v41_v18, %v41_v18  ;;  %v40_v21 = vld [vmem:[%s1076_s1 + $0x28] sm:$0xff]  ;;  %v891_v22 = vld [vmem:[%s1075_s0 + $0x10] sm:$0xff] }
   0x9   :  { %v53_v23 = vmul.f32 %v891_v22, %v891_v22  ;;  %v51_v24 = vmul.f32 %v882_v19, %v882_v19  ;;  %v89_v25 = vmul.f32 %v40_v21, %v40_v21  ;;  %v39_v28 = vld [vmem:[%s1076_s1 + $0x20] sm:$0xff]  ;;  %v38_v30 = vld [vmem:[%s1076_s1 + $0x18] sm:$0xff]  ;;  %v28_v31 = vld [vmem:[%s1075_s0 + $0x8] sm:$0xff]  ;;  %vm341_vm1 = vcmp.lt.s32.totalorder %v330_v62, 48 }
   0xa   :  { %723 = vmatpush.xpose.msk.msra.mxu2 %vm59_vm0, %v48_v4  ;;  %724 = vmatpush.xpose.msk.msra.mxu3 %vm59_vm0, %v48_v4  ;;  %v88_v29 = vmul.f32 %v39_v28, %v39_v28  ;;  %v31_v32 = vld [vmem:[%s1075_s0 + $0x20] sm:$0xff]  ;;  %v30_v33 = vld [vmem:[%s1075_s0 + $0x18] sm:$0xff]  ;;  %v52_v36 = vmul.f32 %v28_v31, %v28_v31  ;;  %v87_v37 = vmul.f32 %v38_v30, %v38_v30  ;;  %v37_v41 = vld [vmem:[%s1076_s1 + $0x10] sm:$0xff] }
   0xb   :  { %697 = vmatpush.xpose.msk.msra.mxu1 %vm59_vm0, %v48_v4  ;;  %v66_v26 = vsel %vm59_vm0, %v53_v23, 0.0  ;;  %v60_v27 = vsel %vm59_vm0, %v51_v24, 0.0  ;;  %v55_v34 = vmul.f32 %v31_v32, %v31_v32  ;;  %v54_v35 = vmul.f32 %v30_v33, %v30_v33  ;;  %v34_v42 = vld [vmem:[%s1075_s0 + $0x38] sm:$0xff]  ;;  %v36_v44 = vld [vmem:[%s1076_s1 + $0x8] sm:$0xff]  ;;  %v33_v46 = vld [vmem:[%s1075_s0 + $0x30] sm:$0xff] }
   0xc   :  { %680 = vmatpush.xpose.msk.msra.mxu0 %vm59_vm0, %v97_v5  ;;  %67 = vadd.xlane.f32.xlu1 %v66_v26  ;;  %v63_v40 = vsel %vm59_vm0, %v52_v36, 0.0  ;;  %v86_v43 = vmul.f32 %v37_v41, %v37_v41  ;;  %v32_v45 = vld [vmem:[%s1075_s0 + $0x28] sm:$0xff]  ;;  %v58_v48 = vmul.f32 %v34_v42, %v34_v42  ;;  %v57_v49 = vmul.f32 %v33_v46, %v33_v46  ;;  %v35_v54 = vld [vmem:[%s1076_s1] sm:$0xff] }
   0xd   :  { %61 = vadd.xlane.f32.xlu0 %v60_v27  ;;  %v72_v38 = vsel %vm59_vm0, %v55_v34, 0.0  ;;  %v69_v39 = vsel %vm59_vm0, %v54_v35, 0.0  ;;  %v56_v47 = vmul.f32 %v32_v45, %v32_v45  ;;  %v85_v50 = vmul.f32 %v36_v44, %v36_v44 }
   0xe   :  { %725 = vmatpush.xpose.msk.msra.mxu2 %vm59_vm0, %v47_v6  ;;  %726 = vmatpush.xpose.msk.msra.mxu3 %vm59_vm0, %v47_v6  ;;  %v81_v52 = vsel %vm59_vm0, %v58_v48, 0.0  ;;  %v78_v53 = vsel %vm59_vm0, %v57_v49, 0.0  ;;  %v84_v55 = vmul.f32 %v35_v54, %v35_v54 }
   0xf   :  { %698 = vmatpush.xpose.msk.msra.mxu1 %vm59_vm0, %v47_v6  ;;  %73 = vadd.xlane.f32.xlu2 %v72_v38  ;;  %v75_v51 = vsel %vm59_vm0, %v56_v47, 0.0 }
  0x10   :  { %681 = vmatpush.xpose.msk.msra.mxu0 %vm59_vm0, %v96_v7 }
  0x12   :  { %727 = vmatpush.xpose.msk.msra.mxu2 %vm59_vm0, %v46_v8  ;;  %728 = vmatpush.xpose.msk.msra.mxu3 %vm59_vm0, %v46_v8 }
  0x13   :  { %699 = vmatpush.xpose.msk.msra.mxu1 %vm59_vm0, %v46_v8 }
  0x14   :  { %682 = vmatpush.xpose.msk.msra.mxu0 %vm59_vm0, %v95_v9  ;;  %70 = vadd.xlane.f32.xlu1 %v69_v39 }
  0x15   :  { %64 = vadd.xlane.f32.xlu0 %v63_v40 }
  0x16   :  { %729 = vmatpush.xpose.msk.msra.mxu2 %vm59_vm0, %v45_v10  ;;  %730 = vmatpush.xpose.msk.msra.mxu3 %vm59_vm0, %v45_v10 }
  0x17   :  { %700 = vmatpush.xpose.msk.msra.mxu1 %vm59_vm0, %v45_v10  ;;  %76 = vadd.xlane.f32.xlu2 %v75_v51 }
  0x18   :  { %683 = vmatpush.xpose.msk.msra.mxu0 %vm59_vm0, %v94_v11 }
  0x1a   :  { %731 = vmatpush.xpose.msk.msra.mxu2 %vm59_vm0, %v44_v12  ;;  %732 = vmatpush.xpose.msk.msra.mxu3 %vm59_vm0, %v44_v12 }
  0x1b   :  { %701 = vmatpush.xpose.msk.msra.mxu1 %vm59_vm0, %v44_v12 }
  0x1c   :  { %684 = vmatpush.xpose.msk.msra.mxu0 %vm59_vm0, %v93_v13  ;;  %82 = vadd.xlane.f32.xlu1 %v81_v52 }
  0x1d   :  { %79 = vadd.xlane.f32.xlu0 %v78_v53 }
  0x1e   :  { %733 = vmatpush.xpose.msk.msra.mxu2 %vm59_vm0, %v43_v14  ;;  %734 = vmatpush.xpose.msk.msra.mxu3 %vm59_vm0, %v43_v14 }
  0x1f   :  { %702 = vmatpush.xpose.msk.msra.mxu1 %vm59_vm0, %v43_v14 }
  0x20   :  { %685 = vmatpush.xpose.msk.msra.mxu0 %vm59_vm0, %v92_v15 }
  0x22   :  { %735 = vmatpush.xpose.msk.msra.mxu2 %vm59_vm0, %v42_v16  ;;  %736 = vmatpush.xpose.msk.msra.mxu3 %vm59_vm0, %v42_v16 }
  0x23   :  { %703 = vmatpush.xpose.msk.msra.mxu1 %vm59_vm0, %v42_v16 }
  0x24   :  { %686 = vmatpush.xpose.msk.msra.mxu0 %vm59_vm0, %v91_v17 }
  0x26   :  { %737 = vmatpush.xpose.msk.msra.mxu2 %vm59_vm0, %v41_v18  ;;  %738 = vmatpush.xpose.msk.msra.mxu3 %vm59_vm0, %v41_v18 }
  0x27   :  { %704 = vmatpush.xpose.msk.msra.mxu1 %vm59_vm0, %v41_v18 }
  0x28   :  { %687 = vmatpush.xpose.msk.msra.mxu0 %vm59_vm0, %v90_v20 }
  0x2a   :  { %739 = vmatpush.xpose.msk.msra.mxu2 %vm59_vm0, %v40_v21  ;;  %740 = vmatpush.xpose.msk.msra.mxu3 %vm59_vm0, %v40_v21 }
  0x2b   :  { %705 = vmatpush.xpose.msk.msra.mxu1 %vm59_vm0, %v40_v21 }
  0x2c   :  { %688 = vmatpush.xpose.msk.msra.mxu0 %vm59_vm0, %v89_v25 }
  0x2e   :  { %741 = vmatpush.xpose.msk.msra.mxu2 %vm59_vm0, %v39_v28  ;;  %742 = vmatpush.xpose.msk.msra.mxu3 %vm59_vm0, %v39_v28 }
  0x2f   :  { %706 = vmatpush.xpose.msk.msra.mxu1 %vm59_vm0, %v39_v28  ;;  %v311_v28 = vshrl.u32 %v310_v58, 7 }
  0x30   :  { %689 = vmatpush.xpose.msk.msra.mxu0 %vm59_vm0, %v88_v29 }
  0x32   :  { %743 = vmatpush.xpose.msk.msra.mxu2 %vm59_vm0, %v38_v30  ;;  %744 = vmatpush.xpose.msk.msra.mxu3 %vm59_vm0, %v38_v30 }
  0x33   :  { %707 = vmatpush.xpose.msk.msra.mxu1 %vm59_vm0, %v38_v30 }
  0x34   :  { %690 = vmatpush.xpose.msk.msra.mxu0 %vm59_vm0, %v87_v37 }
  0x36   :  { %745 = vmatpush.xpose.msk.msra.mxu2 %vm59_vm0, %v37_v41  ;;  %746 = vmatpush.xpose.msk.msra.mxu3 %vm59_vm0, %v37_v41 }
  0x37   :  { %708 = vmatpush.xpose.msk.msra.mxu1 %vm59_vm0, %v37_v41 }
  0x38   :  { %691 = vmatpush.xpose.msk.msra.mxu0 %vm59_vm0, %v86_v43 }
  0x3a   :  { %747 = vmatpush.xpose.msk.msra.mxu2 %vm59_vm0, %v36_v44  ;;  %748 = vmatpush.xpose.msk.msra.mxu3 %vm59_vm0, %v36_v44 }
  0x3b   :  { %709 = vmatpush.xpose.msk.msra.mxu1 %vm59_vm0, %v36_v44 }
  0x3c   :  { %692 = vmatpush.xpose.msk.msra.mxu0 %vm59_vm0, %v85_v50 }
  0x3e   :  { %749 = vmatpush.xpose.msk.msra.mxu2 %vm59_vm0, %v35_v54  ;;  %750 = vmatpush.xpose.msk.msra.mxu3 %vm59_vm0, %v35_v54 }
  0x3f   :  { %710 = vmatpush.xpose.msk.msra.mxu1 %vm59_vm0, %v35_v54 }
  0x40   :  { %693 = vmatpush.xpose.msk.msra.mxu0 %vm59_vm0, %v84_v55 }
  0x41   :  { %712 = vmatmul.msk.f32.vlgmr.msra.gmra.mxu2 %vm59_vm0, %v28_v31  ;;  %715 = vmatmul.msk.f32.vlgmr.msra.gmra.mxu3 %vm59_vm0, %v31_v32 }
  0x42   :  { %711 = vmatmul.msk.f32.vlgmr.msra.gmra.mxu1 %vm59_vm0, %v882_v19 }
  0x43   :  { %694 = vmatmul.msk.f32.vlgmr.msra.gmra.mxu0 %vm59_vm0, %v795_v56 }
  0x49   :  { %716 = vmatmul.msk.f32.gmra.mxu3 %vm59_vm0, %v32_v45  ;;  %713 = vmatmul.msk.f32.gmra.mxu2 %vm59_vm0, %v891_v22 }
  0x51   :  { %717 = vmatmul.msk.f32.gmra.mxu3 %vm59_vm0, %v33_v46  ;;  %714 = vmatmul.msk.f32.gmra.mxu2 %vm59_vm0, %v30_v33  ;;  %v589_v33 = vmul.u32 128, %v311_v28 }
  0x53   :  { %v590_v36 = vadd.s32 %v589_v33, %v330_v62 }
  0x55   :  { %vm605_vm3 = vcmp.lt.s32.totalorder %v590_v36, 48 }
  0x59   :  { %718 = vmatmul.msk.f32.gmra.mxu3 %vm59_vm0, %v34_v42 }
  0x7f   :  { %v68_v8 = vpop.xlane.xlu1 %67 }
  0x80   :  { %v62_v57 = vpop.xlane.xlu0 %61 }
  0x82   :  { %v74_v2 = vpop.xlane.xlu2 %73 }
  0x87   :  { %v71_v21 = vpop.xlane.xlu1 %70 }
  0x88   :  { %v65_v61 = vpop.xlane.xlu0 %64 }
  0x8a   :  { %v77_v19 = vpop.xlane.xlu2 %76 }
  0x8f   :  { %v83_v40 = vpop.xlane.xlu1 %82 }
  0x90   :  { %v80_v32 = vpop.xlane.xlu0 %79 }
  0xbf   :  { %v260_v59 = vpop.f32.mrf.mxu1 }
  0xc0   :  { %v168_v60 = vpop.f32.mrf.mxu0  ;;  %v293_v0 = vmul.f32 2.0, %v260_v59 }
  0xc1   :  { %v284_v63 = vperm.slane %v168_v60, 0 }
  0xc3   :  { %v285_v1 = vadd.f32 %v284_v63, %v62_v57  ;;  %v286_v3 = vadd.f32 %v284_v63, %v65_v61  ;;  %v289_v12 = vadd.f32 %v284_v63, %v74_v2  ;;  %v287_v14 = vadd.f32 %v284_v63, %v68_v8 }
  0xc4   :  { %v272_v4 = vpop.f32.mrf.mxu3  ;;  %v263_v5 = vpop.f32.mrf.mxu2  ;;  %v290_v23 = vadd.f32 %v284_v63, %v77_v19  ;;  %v288_v29 = vadd.f32 %v284_v63, %v71_v21  ;;  %v291_v37 = vadd.f32 %v284_v63, %v80_v32  ;;  %v292_v43 = vadd.f32 %v284_v63, %v83_v40 }
  0xc5   :  { %v301_v6 = vsub.f32 %v285_v1, %v293_v0  ;;  %v294_v7 = vmul.f32 2.0, %v263_v5  ;;  %v297_v11 = vmul.f32 2.0, %v272_v4 }
  0xc7   :  { %v350_v9 = vsel %vm341_vm1, %v301_v6, 1e+30  ;;  %v302_v10 = vsub.f32 %v286_v3, %v294_v7  ;;  %v305_v18 = vsub.f32 %v289_v12, %v297_v11  ;;  %v796_v11 = vmov 0.0  }
  0xc8   :  { %358 = vmin.xlane.f32.xlu2 %v350_v9  ;;  %19 = vst.msk [vmem:[#allocation4] sm:$0xff] %vm18_vm6, %v796_v11 }
  0xc9   :  { %v351_v13 = vsel %vm341_vm1, %v302_v10, 1e+30  ;;  %v354_v25 = vsel %vm341_vm1, %v305_v18, 1e+30  ;;  %20 = vst.msk [vmem:[#allocation4 + $0x8] sm:$0xff] %vm18_vm6, %v796_v11 }
  0xca   :  { %360 = vmin.xlane.f32.xlu0 %v351_v13  ;;  %v374_v49 = vmin.f32 %v350_v9, %v354_v25  ;;  %21 = vst.msk [vmem:[#allocation4 + $0x10] sm:$0xff] %vm18_vm6, %v796_v11 }
  0xcb   :  { %22 = vst.msk [vmem:[#allocation4 + $0x18] sm:$0xff] %vm18_vm6, %v796_v11 }
  0xcc   :  { %v275_v15 = vpop.f32.mrf.mxu3  ;;  %v266_v16 = vpop.f32.mrf.mxu2  ;;  %23 = vst.msk [vmem:[#allocation4 + $0x20] sm:$0xff] %vm18_vm6, %v796_v11 }
  0xcd   :  { %v295_v17 = vmul.f32 2.0, %v266_v16  ;;  %v298_v22 = vmul.f32 2.0, %v275_v15  ;;  %24 = vst.msk [vmem:[#allocation4 + $0x28] sm:$0xff] %vm18_vm6, %v796_v11 }
  0xce   :  { %25 = vst.msk [vmem:[#allocation4 + $0x30] sm:$0xff] %vm18_vm6, %v796_v11 }
  0xcf   :  { %v303_v20 = vsub.f32 %v287_v14, %v295_v17  ;;  %v306_v31 = vsub.f32 %v290_v23, %v298_v22  ;;  %26 = vst.msk [vmem:[#allocation4 + $0x38] sm:$0xff] %vm18_vm6, %v796_v11 }
  0xd1   :  { %v352_v24 = vsel %vm341_vm1, %v303_v20, 1e+30  ;;  %v355_v38 = vsel %vm341_vm1, %v306_v31, 1e+30 }
  0xd2   :  { %362 = vmin.xlane.f32.xlu1 %v352_v24  ;;  %366 = vmin.xlane.f32.xlu0 %v354_v25  ;;  %v375_v47 = vmin.f32 %v351_v13, %v355_v38 }
  0xd4   :  { %v269_v26 = vpop.f32.mrf.mxu2  ;;  %v278_v27 = vpop.f32.mrf.mxu3  ;;  %v378_v52 = vmin.f32 %v374_v49, %v375_v47 }
  0xd5   :  { %v296_v30 = vmul.f32 2.0, %v269_v26  ;;  %v299_v35 = vmul.f32 2.0, %v278_v27 }
  0xd7   :  { %v304_v34 = vsub.f32 %v288_v29, %v296_v30  ;;  %v307_v41 = vsub.f32 %v291_v37, %v299_v35 }
  0xd9   :  { %v353_v39 = vsel %vm341_vm1, %v304_v34, 1e+30  ;;  %v356_v46 = vsel %vm341_vm1, %v307_v41, 1e+30 }
  0xda   :  { %368 = vmin.xlane.f32.xlu1 %v355_v38  ;;  %364 = vmin.xlane.f32.xlu2 %v353_v39  ;;  %v376_v51 = vmin.f32 %v352_v24, %v356_v46 }
  0xdc   :  { %v281_v42 = vpop.f32.mrf.mxu3 }
  0xdd   :  { %v300_v44 = vmul.f32 2.0, %v281_v42 }
  0xdf   :  { %v308_v45 = vsub.f32 %v292_v43, %v300_v44 }
  0xe1   :  { %v357_v48 = vsel %vm341_vm1, %v308_v45, 1e+30 }
  0xe2   :  { %v377_v50 = vmin.f32 %v353_v39, %v357_v48  ;;  %372 = vmin.xlane.f32.xlu0 %v357_v48  ;;  %370 = vmin.xlane.f32.xlu2 %v356_v46 }
  0xe4   :  { %v379_v53 = vmin.f32 %v376_v51, %v377_v50 }
  0xe6   :  { %v380_v54 = vmin.f32 %v378_v52, %v379_v53  ;;  %v554_v53 = vld [vmem:[#allocation4] sm:$0xff] }
  0xe8   :  { %v381_v55 = vrot.slane %v380_v54, 4 }
  0xea   :  { %v382_v56 = vmin.f32 %v380_v54, %v381_v55 }
  0xec   :  { %v383_v57 = vrot.slane %v382_v56, 2 }
  0xee   :  { %v384_v58 = vmin.f32 %v382_v56, %v383_v57  ;;  %v555_v56 = vld [vmem:[#allocation4 + $0x8] sm:$0xff] }
  0xf0   :  { %v385_v59 = vrot.slane %v384_v58, 1 }
  0xf2   :  { %v386_v60 = vmin.f32 %v384_v58, %v385_v59 }
  0xf4   :  { %431 = vst [vmem:[#allocation3] sm:$0x1] %v386_v60 }
  0xfb   :  { %v591_v61 = vld [vmem:[#allocation3] sm:$0x1] }
  0xfc   :  { %v592_v63 = vmax.f32 %v591_v61, 0.0 }
  0xfe   :  { %761 = vrsqrt.f32 %v592_v63  ;;  %vm600_vm2 = vcmp.eq.f32.partialorder %v592_v63, inf  ;;  %v603_v6 = vand.u32 2147483648, %v592_v63  ;;  %vm602_vm4 = vcmp.eq.f32.partialorder %v592_v63, 0.0 }
 0x104   :  { %v762_v62 = vpop.eup %761 }
 0x105   :  { %v594_v0 = vmul.f32 %v762_v62, %v592_v63 }
 0x107   :  { %v595_v1 = vmul.f32 %v762_v62, %v594_v0 }
 0x109   :  { %v596_v2 = vmul.f32 0.5, %v595_v1 }
 0x10b   :  { %v597_v3 = vsub.f32 1.5, %v596_v2 }
 0x10d   :  { %v598_v4 = vmul.f32 %v762_v62, %v597_v3 }
 0x10f   :  { %v599_v5 = vmul.f32 %v598_v4, %v592_v63 }
 0x111   :  { %v601_v7 = vsel %vm600_vm2, %v592_v63, %v599_v5 }
 0x112   :  { %v604_v8 = vsel %vm602_vm4, %v603_v6, %v601_v7 }
 0x113   :  { %v606_v9 = vsel %vm605_vm3, %v604_v8, 0.0 }
 0x114   :  { %v608_v10 = vsel %vm607_vm5, %v606_v9, 0.0 }
 0x115   :  { %609 = vadd.xlane.f32.xlu1 %v608_v10 }
 0x13b   :  { %v359_v12 = vpop.xlane.xlu2 %358 }
 0x13c   :  { %391 = vst.msk [vmem:[#allocation2] sm:$0xff] %vm18_vm6, %v359_v12 }
 0x13d   :  { %v361_v13 = vpop.xlane.xlu0 %360 }
 0x13e   :  { %392 = vst.msk [vmem:[#allocation2 + $0x8] sm:$0xff] %vm18_vm6, %v361_v13 }
 0x143   :  { %v442_v14 = vld [vmem:[#allocation2] sm:$0xff] }
 0x144   :  { %v450_v15 = vmax.f32 %v442_v14, 0.0 }
 0x145   :  { %v443_v16 = vld [vmem:[#allocation2 + $0x8] sm:$0xff]  ;;  %v363_v17 = vpop.xlane.xlu1 %362  ;;  %v367_v18 = vpop.xlane.xlu0 %366 }
 0x146   :  { %763 = vrsqrt.f32 %v450_v15  ;;  %v451_v19 = vmax.f32 %v443_v16, 0.0  ;;  %393 = vst.msk [vmem:[#allocation2 + $0x10] sm:$0xff] %vm18_vm6, %v363_v17  ;;  %vm465_vm7 = vcmp.eq.f32.partialorder %v450_v15, inf  ;;  %v468_v48 = vand.u32 2147483648, %v450_v15  ;;  %v556_v16 = vld [vmem:[#allocation4 + $0x10] sm:$0xff] }
 0x147   :  { %395 = vst.msk [vmem:[#allocation2 + $0x20] sm:$0xff] %vm18_vm6, %v367_v18  ;;  %vm467_vm8 = vcmp.eq.f32.partialorder %v450_v15, 0.0 }
 0x148   :  { %765 = vrsqrt.f32 %v451_v19  ;;  %vm477_vm9 = vcmp.eq.f32.partialorder %v451_v19, inf  ;;  %v480_v54 = vand.u32 2147483648, %v451_v19  ;;  %vm479_vm10 = vcmp.eq.f32.partialorder %v451_v19, 0.0 }
 0x14c   :  { %v764_v20 = vpop.eup %763 }
 0x14d   :  { %v459_v21 = vmul.f32 %v764_v20, %v450_v15  ;;  %v444_v22 = vld [vmem:[#allocation2 + $0x10] sm:$0xff]  ;;  %v369_v23 = vpop.xlane.xlu1 %368  ;;  %v365_v24 = vpop.xlane.xlu2 %364 }
 0x14e   :  { %v766_v25 = vpop.eup %765  ;;  %v997_v26 = vmax.f32 %v444_v22, 0.0  ;;  %v446_v27 = vld [vmem:[#allocation2 + $0x20] sm:$0xff]  ;;  %396 = vst.msk [vmem:[#allocation2 + $0x28] sm:$0xff] %vm18_vm6, %v369_v23 }
 0x14f   :  { %v460_v28 = vmul.f32 %v764_v20, %v459_v21  ;;  %v471_v29 = vmul.f32 %v766_v25, %v451_v19  ;;  %v1000_v30 = vmax.f32 %v446_v27, 0.0  ;;  %394 = vst.msk [vmem:[#allocation2 + $0x18] sm:$0xff] %vm18_vm6, %v365_v24  ;;  %v558_v23 = vld [vmem:[#allocation4 + $0x20] sm:$0xff] }
 0x150   :  { %767 = vrsqrt.f32 %v997_v26  ;;  %vm489_vm11 = vcmp.eq.f32.partialorder %v997_v26, inf  ;;  %vm491_vm12 = vcmp.eq.f32.partialorder %v997_v26, 0.0 }
 0x151   :  { %v461_v31 = vmul.f32 0.5, %v460_v28  ;;  %v472_v32 = vmul.f32 %v766_v25, %v471_v29  ;;  %769 = vrsqrt.f32 %v1000_v30  ;;  %vm513_vm13 = vcmp.eq.f32.partialorder %v1000_v30, inf }
 0x152   :  { %v516_v22 = vand.u32 2147483648, %v1000_v30  ;;  %vm515_vm14 = vcmp.eq.f32.partialorder %v1000_v30, 0.0 }
 0x153   :  { %v462_v33 = vsub.f32 1.5, %v461_v31  ;;  %v473_v34 = vmul.f32 0.5, %v472_v32 }
 0x155   :  { %v463_v35 = vmul.f32 %v764_v20, %v462_v33  ;;  %v474_v36 = vsub.f32 1.5, %v473_v34  ;;  %v447_v37 = vld [vmem:[#allocation2 + $0x28] sm:$0xff]  ;;  %v371_v38 = vpop.xlane.xlu2 %370  ;;  %v373_v39 = vpop.xlane.xlu0 %372 }
 0x156   :  { %v768_v40 = vpop.eup %767  ;;  %v1005_v41 = vmax.f32 %v447_v37, 0.0  ;;  %v445_v42 = vld [vmem:[#allocation2 + $0x18] sm:$0xff]  ;;  %397 = vst.msk [vmem:[#allocation2 + $0x30] sm:$0xff] %vm18_vm6, %v371_v38 }
 0x157   :  { %v770_v43 = vpop.eup %769  ;;  %v464_v44 = vmul.f32 %v463_v35, %v450_v15  ;;  %v475_v45 = vmul.f32 %v766_v25, %v474_v36  ;;  %v483_v46 = vmul.f32 %v768_v40, %v997_v26  ;;  %v1009_v47 = vmax.f32 %v445_v42, 0.0  ;;  %398 = vst.msk [vmem:[#allocation2 + $0x38] sm:$0xff] %vm18_vm6, %v373_v39  ;;  %v559_v42 = vld [vmem:[#allocation4 + $0x28] sm:$0xff] }
 0x158   :  { %v507_v49 = vmul.f32 %v770_v43, %v1000_v30  ;;  %771 = vrsqrt.f32 %v1005_v41  ;;  %vm525_vm15 = vcmp.eq.f32.partialorder %v1005_v41, inf  ;;  %vm527_vm0 = vcmp.eq.f32.partialorder %v1005_v41, 0.0 }
 0x159   :  { %v476_v50 = vmul.f32 %v475_v45, %v451_v19  ;;  %v484_v51 = vmul.f32 %v768_v40, %v483_v46  ;;  %773 = vrsqrt.f32 %v1009_v47  ;;  %v466_v52 = vsel %vm465_vm7, %v450_v15, %v464_v44  ;;  %v557_v46 = vld [vmem:[#allocation4 + $0x18] sm:$0xff] }
 0x15a   :  { %v469_v55 = vsel %vm467_vm8, %v468_v48, %v466_v52  ;;  %v508_v59 = vmul.f32 %v770_v43, %v507_v49  ;;  %v492_v15 = vand.u32 2147483648, %v997_v26  ;;  %v528_v39 = vand.u32 2147483648, %v1005_v41 }
 0x15b   :  { %v485_v57 = vmul.f32 0.5, %v484_v51  ;;  %v478_v58 = vsel %vm477_vm9, %v451_v19, %v476_v50  ;;  %v570_v61 = vadd.f32 %v554_v53, %v469_v55  ;;  %vm501_vm1 = vcmp.eq.f32.partialorder %v1009_v47, inf }
 0x15c   :  { %v481_v60 = vsel %vm479_vm10, %v480_v54, %v478_v58  ;;  %v509_v0 = vmul.f32 0.5, %v508_v59  ;;  %vm503_vm2 = vcmp.eq.f32.partialorder %v1009_v47, 0.0 }
 0x15d   :  { %v486_v63 = vsub.f32 1.5, %v485_v57  ;;  %v448_v62 = vld [vmem:[#allocation2 + $0x30] sm:$0xff]  ;;  %v571_v1 = vadd.f32 %v555_v56, %v481_v60  ;;  %579 = vst.msk [vmem:[#allocation4] sm:$0xff] %vm18_vm6, %v570_v61 }
 0x15e   :  { %v772_v2 = vpop.eup %771  ;;  %v1016_v3 = vmax.f32 %v448_v62, 0.0  ;;  %v449_v4 = vld [vmem:[#allocation2 + $0x38] sm:$0xff]  ;;  %v510_v9 = vsub.f32 1.5, %v509_v0 }
 0x15f   :  { %v774_v5 = vpop.eup %773  ;;  %v487_v6 = vmul.f32 %v768_v40, %v486_v63  ;;  %v519_v7 = vmul.f32 %v772_v2, %v1005_v41  ;;  %v1020_v8 = vmax.f32 %v449_v4, 0.0  ;;  %580 = vst.msk [vmem:[#allocation4 + $0x8] sm:$0xff] %vm18_vm6, %v571_v1  ;;  %v560_v63 = vld [vmem:[#allocation4 + $0x30] sm:$0xff] }
 0x160   :  { %v495_v10 = vmul.f32 %v774_v5, %v1009_v47  ;;  %775 = vrsqrt.f32 %v1016_v3  ;;  %v511_v12 = vmul.f32 %v770_v43, %v510_v9  ;;  %v504_v43 = vand.u32 2147483648, %v1009_v47 }
 0x161   :  { %v488_v11 = vmul.f32 %v487_v6, %v997_v26  ;;  %777 = vrsqrt.f32 %v1020_v8  ;;  %v520_v13 = vmul.f32 %v772_v2, %v519_v7  ;;  %vm537_vm3 = vcmp.eq.f32.partialorder %v1016_v3, inf }
 0x162   :  { %v496_v14 = vmul.f32 %v774_v5, %v495_v10  ;;  %v512_v18 = vmul.f32 %v511_v12, %v1000_v30  ;;  %vm539_vm4 = vcmp.eq.f32.partialorder %v1016_v3, 0.0  ;;  %v540_v60 = vand.u32 2147483648, %v1016_v3 }
 0x163   :  { %v490_v17 = vsel %vm489_vm11, %v997_v26, %v488_v11  ;;  %v521_v19 = vmul.f32 0.5, %v520_v13  ;;  %vm549_vm5 = vcmp.eq.f32.partialorder %v1020_v8, inf  ;;  %vm551_vm7 = vcmp.eq.f32.partialorder %v1020_v8, 0.0 }
 0x164   :  { %v497_v20 = vmul.f32 0.5, %v496_v14  ;;  %v493_v21 = vsel %vm491_vm12, %v492_v15, %v490_v17  ;;  %v514_v24 = vsel %vm513_vm13, %v1000_v30, %v512_v18  ;;  %v618_v59 = vld [vmem:[#allocation4] sm:$0xff]  ;;  %v552_v1 = vand.u32 2147483648, %v1020_v8 }
 0x165   :  { %v522_v25 = vsub.f32 1.5, %v521_v19  ;;  %v572_v27 = vadd.f32 %v556_v16, %v493_v21  ;;  %v517_v31 = vsel %vm515_vm14, %v516_v22, %v514_v24  ;;  %v627_v6 = vsel %vm18_vm6, %v618_v59, 0.0 }
 0x166   :  { %v776_v28 = vpop.eup %775  ;;  %v498_v29 = vsub.f32 1.5, %v497_v20  ;;  %v574_v34 = vadd.f32 %v558_v23, %v517_v31  ;;  %v619_v57 = vld [vmem:[#allocation4 + $0x8] sm:$0xff] }
 0x167   :  { %v778_v26 = vpop.eup %777  ;;  %v523_v32 = vmul.f32 %v772_v2, %v522_v25  ;;  %v531_v33 = vmul.f32 %v776_v28, %v1016_v3  ;;  %581 = vst.msk [vmem:[#allocation4 + $0x10] sm:$0xff] %vm18_vm6, %v572_v27  ;;  %v628_v62 = vsel %vm18_vm6, %v619_v57, 0.0  ;;  %v561_v2 = vld [vmem:[#allocation4 + $0x38] sm:$0xff] }
 0x168   :  { %v499_v35 = vmul.f32 %v774_v5, %v498_v29  ;;  %v543_v36 = vmul.f32 %v778_v26, %v1020_v8  ;;  %583 = vst.msk [vmem:[#allocation4 + $0x20] sm:$0xff] %vm18_vm6, %v574_v34  ;;  %v629_v11 = vadd.f32 %v628_v62, %v627_v6 }
 0x169   :  { %v524_v37 = vmul.f32 %v523_v32, %v1005_v41  ;;  %v532_v30 = vmul.f32 %v776_v28, %v531_v33 }
 0x16a   :  { %v500_v38 = vmul.f32 %v499_v35, %v1009_v47  ;;  %v544_v40 = vmul.f32 %v778_v26, %v543_v36  ;;  %v797_v35 = vmov 112.0  }
 0x16b   :  { %v526_v44 = vsel %vm525_vm15, %v1005_v41, %v524_v37  ;;  %v533_v45 = vmul.f32 0.5, %v532_v30  ;;  %779 = vrcp.f32 %v797_v35 }
 0x16c   :  { %v502_v48 = vsel %vm501_vm1, %v1009_v47, %v500_v38  ;;  %v529_v49 = vsel %vm527_vm0, %v528_v39, %v526_v44  ;;  %v545_v50 = vmul.f32 0.5, %v544_v40 }
 0x16d   :  { %v505_v51 = vsel %vm503_vm2, %v504_v43, %v502_v48  ;;  %v534_v52 = vsub.f32 1.5, %v533_v45  ;;  %v575_v53 = vadd.f32 %v559_v42, %v529_v49 }
 0x16e   :  { %v546_v54 = vsub.f32 1.5, %v545_v50  ;;  %v573_v55 = vadd.f32 %v557_v46, %v505_v51  ;;  %v620_v47 = vld [vmem:[#allocation4 + $0x10] sm:$0xff] }
 0x16f   :  { %v535_v56 = vmul.f32 %v776_v28, %v534_v52  ;;  %584 = vst.msk [vmem:[#allocation4 + $0x28] sm:$0xff] %vm18_vm6, %v575_v53  ;;  %v630_v7 = vsel %vm18_vm6, %v620_v47, 0.0  ;;  %v622_v13 = vld [vmem:[#allocation4 + $0x20] sm:$0xff] }
 0x170   :  { %v547_v58 = vmul.f32 %v778_v26, %v546_v54  ;;  %582 = vst.msk [vmem:[#allocation4 + $0x18] sm:$0xff] %vm18_vm6, %v573_v55  ;;  %v631_v14 = vadd.f32 %v630_v7, %v629_v11 }
 0x171   :  { %v536_v41 = vmul.f32 %v535_v56, %v1016_v3  ;;  %v780_v36 = vpop.eup %779 }
 0x172   :  { %v548_v61 = vmul.f32 %v547_v58, %v1020_v8  ;;  %v653_v37 = vmul.f32 112.0, %v780_v36 }
 0x173   :  { %v538_v0 = vsel %vm537_vm3, %v1016_v3, %v536_v41 }
 0x174   :  { %v541_v4 = vsel %vm539_vm4, %v540_v60, %v538_v0  ;;  %v550_v5 = vsel %vm549_vm5, %v1020_v8, %v548_v61  ;;  %v634_v8 = vsel %vm18_vm6, %v622_v13, 0.0  ;;  %v654_v30 = vsub.f32 1.0, %v653_v37 }
 0x175   :  { %v553_v9 = vsel %vm551_vm7, %v552_v1, %v550_v5  ;;  %v576_v10 = vadd.f32 %v560_v63, %v541_v4 }
 0x176   :  { %v577_v12 = vadd.f32 %v561_v2, %v553_v9  ;;  %v623_v17 = vld [vmem:[#allocation4 + $0x28] sm:$0xff]  ;;  %v655_v42 = vmul.f32 %v780_v36, %v654_v30 }
 0x177   :  { %585 = vst.msk [vmem:[#allocation4 + $0x30] sm:$0xff] %vm18_vm6, %v576_v10  ;;  %v621_v3 = vld [vmem:[#allocation4 + $0x18] sm:$0xff]  ;;  %v636_v19 = vsel %vm18_vm6, %v623_v17, 0.0 }
 0x178   :  { %586 = vst.msk [vmem:[#allocation4 + $0x38] sm:$0xff] %vm18_vm6, %v577_v12  ;;  %v632_v15 = vsel %vm18_vm6, %v621_v3, 0.0  ;;  %v656_v45 = vadd.f32 %v780_v36, %v655_v42 }
 0x179   :  { %v633_v16 = vadd.f32 %v632_v15, %v631_v14 }
 0x17b   :  { %v635_v18 = vadd.f32 %v634_v8, %v633_v16 }
 0x17d   :  { %v637_v21 = vadd.f32 %v636_v19, %v635_v18 }
 0x17e   :  { %v624_v20 = vld [vmem:[#allocation4 + $0x30] sm:$0xff] }
 0x17f   :  { %v625_v22 = vld [vmem:[#allocation4 + $0x38] sm:$0xff]  ;;  %v638_v23 = vsel %vm18_vm6, %v624_v20, 0.0 }
 0x180   :  { %v639_v24 = vadd.f32 %v638_v23, %v637_v21  ;;  %v640_v25 = vsel %vm18_vm6, %v625_v22, 0.0  ;;  %vm657_vm6 = vweird.f32 %v780_v36 }
 0x181   :  { %v658_v49 = vsel %vm657_vm6, %v780_v36, %v656_v45 }
 0x182   :  { %v641_v27 = vadd.f32 %v640_v25, %v639_v24 }
 0x184   :  { %642 = vadd.xlane.f32.xlu2 %v641_v27 }
 0x188   :  { %v610_v28 = vpop.xlane.xlu1 %609 }
 0x189   :  { %v611_v29 = vrot.slane %v610_v28, 4 }
 0x18b   :  { %v612_v31 = vadd.f32 %v611_v29, %v610_v28 }
 0x18d   :  { %v613_v26 = vrot.slane %v612_v31, 2 }
 0x18f   :  { %v614_v32 = vadd.f32 %v613_v26, %v612_v31 }
 0x191   :  { %v615_v33 = vrot.slane %v614_v32, 1 }
 0x193   :  { %v616_v34 = vadd.f32 %v615_v33, %v614_v32 }
 0x195   :  { %751 = vpush %v616_v34 }
 0x1c6   :  { %s752_s1 = spop %751 }
 0x1f7   :  { %v643_v38 = vpop.xlane.xlu2 %642 }
 0x1f8   :  { %v644_v39 = vrot.slane %v643_v38, 4 }
 0x1fa   :  { %v645_v40 = vadd.f32 %v644_v39, %v643_v38 }
 0x1fc   :  { %v646_v43 = vrot.slane %v645_v40, 2 }
 0x1fe   :  { %v647_v44 = vadd.f32 %v646_v43, %v645_v40 }
 0x200   :  { %v648_v46 = vrot.slane %v647_v44, 1 }
 0x202   :  { %v649_v48 = vadd.f32 %v648_v46, %v647_v44 }
 0x204   :  { %753 = vpush %v649_v48 }
 0x205   :  { %755 = vpush %v658_v49 }
 0x235   :  { %s754_s28 = spop %753 }
 0x236   :  { %s651_s4 = sadd.f32 %s754_s28, %s752_s1  ;;  %s756_s5 = spop %755 }
 0x238   :  { %s660_s6 = smul.f32 %s756_s5, %s651_s4 }
 0x23a   :  { %662 = sst [smem:[#allocation5]] %s660_s6 }
 0x23b   :  { %671 = dma.smem_to_hbm %s798_s7, 16, %s669_s3, [#allocation6]  }
 0x23c   :  { %793 = dma.done.wait [#allocation6], 16  }
 0x23d   :  { %794 = vsyncadd [#allocation6], 4294967280 }
 0x23e   :  { %676 = sfence }
 0x23f   :  { %677 = vsyncpa [#allocation6], 1 }

</bundles_post_ra>
